<compile_context>
chip_gen: v5e
topology: v5e:2x2
jax: 0.10.0
libtpu: 0.0.40
codegen_flags: <defaults>
</compile_context>

<pallas_src>
import jax
import jax.numpy as jnp
from jax.experimental import pallas as pl
from jax.experimental.pallas import tpu as pltpu

LANE = 128                      # vreg lane width
TILE_TARGET_BYTES = 4 << 20     # ~4 MiB per output tile: amortizes per-step cost
                                # (~85-90% of HBM roofline) while 2x-in + 2x-out
                                # double buffers stay ~16 MiB, inside v7x's
                                # 32 MiB scoped-VMEM default.
SMALL_FASTPATH_BYTES = 1 << 20  # below this total output size, XLA's broadcast
                                # beats kernel launch + pipeline prologue.


def _mc_expand_kernel(x_ref, o_ref):
    # Replicating copy.  `input * ones(...)` is value-preserving apart from the
    # torch type promotion, which is the (free, VPU) astype on the store.
    o_ref[...] = x_ref[...].astype(o_ref.dtype)


def mc_expand(x, nmc, *, force_pallas=False, tile_rows=None):
    """Replicate `x` across a leading Monte-Carlo axis (Pallas TPU kernel).

    Equivalent to PyTorch `input * torch.ones(nmc, *input.size())`, including the
    type promotion against float32 ones.
    """
    orig_shape = x.shape
    out_dtype = jnp.promote_types(x.dtype, jnp.float32)   # torch.ones is float32
    in_item = jnp.dtype(x.dtype).itemsize
    out_item = jnp.dtype(out_dtype).itemsize

    n = int(x.size)
    total_out_bytes = nmc * n * out_item

    # Small-input fast path: for tiny tensors the kernel launch dominates the
    # sub-microsecond copy; XLA's native broadcast is strictly better there.
    if not force_pallas and total_out_bytes < SMALL_FASTPATH_BYTES:
        return jnp.broadcast_to(x.astype(out_dtype)[None], (nmc,) + orig_shape)

    # Sublane divisibility: 8 rows for 4-byte, 16 for 2-byte, 32 for 1-byte dtypes.
    sub = max(8, 32 // max(min(in_item, out_item), 1))

    rows = -(-n // LANE)                      # lane-dense 128-wide rows
    pad = rows * LANE - n                     # at most LANE-1 elements

    # Row-tile size: the full row extent if it fits the tile budget (a block dim
    # equal to the full array dim needs no (8,128) divisibility); otherwise a
    # multiple of `sub` sized for ~TILE_TARGET_BYTES output tiles.  The last
    # (partial) row-tile is handled by Pallas boundary masking, so `rows` is
    # never padded up to a whole tile.
    tr_max = max(sub, (TILE_TARGET_BYTES // (LANE * max(in_item, out_item))) // sub * sub)
    if tile_rows is not None:
        tr = int(tile_rows)                   # test / tuning override
    elif rows <= tr_max:
        tr = rows
    else:
        tr = tr_max
    grid_r = -(-rows // tr)

    flat = x.reshape(-1)
    if pad:
        # TODO(synk): a lane-masked tail store would avoid this <=127-element pad
        # and the post-kernel slice; both are at most one 128-lane row of work.
        flat = jnp.pad(flat, (0, pad))
    x2d = flat.reshape(rows, LANE)

    # VMEM cap derived from actual usage (2 input + 2 output double buffers) plus
    # ~30% headroom; never requests more than is useful on v7x's 64 MiB VMEM.
    tile_in = tr * LANE * in_item
    tile_out = tr * LANE * out_item
    vmem_bytes = int(min(48 << 20, max(2 << 20, int(1.3 * (2 * tile_in + 2 * tile_out)))))

    # TODO(synk): a further ~few-% win is a manual VMEM->HBM fan-out (output in
    # memory_space=pl.ANY, nmc make_async_copy per row-tile) that skips the
    # in-body vreg round-trip; kept on auto-pipelining for robustness.
    out = pl.pallas_call(
        _mc_expand_kernel,
        out_shape=jax.ShapeDtypeStruct((nmc, rows, LANE), out_dtype),
        # Row axis leading, nmc innermost with an input block index constant
        # along it, so each input tile is fetched from HBM once and written nmc
        # times.  Both axes are independent (no carried state) -> both
        # "parallel", so v7x megacore can shard over nmc even when grid_r == 1.
        grid=(grid_r, nmc),
        in_specs=[pl.BlockSpec((tr, LANE), lambda r, m: (r, 0))],
        out_specs=pl.BlockSpec((None, tr, LANE), lambda r, m: (m, r, 0)),
        compiler_params=pltpu.CompilerParams(
            dimension_semantics=("parallel", "parallel"),
            vmem_limit_bytes=vmem_bytes,
        ),
        cost_estimate=pl.CostEstimate(
            flops=0,
            transcendentals=0,
            bytes_accessed=n * in_item + nmc * rows * LANE * out_item,
        ),
    )(x2d)

    if pad:
        out = out.reshape(nmc, rows * LANE)[:, :n]
    return out.reshape((nmc,) + orig_shape)


class BaseBayesianNetPallas:
    """JAX/Pallas counterpart of vardl.models.BaseBayesianNet."""

    def __init__(self, nmc):
        self.nmc = nmc
        # TODO(synk): BaseBayesianNet.__init__ sets architecture=None (filled by
        # subclasses); modeled as identity so forward() is runnable.  When the
        # downstream architecture is known, fold nmc into its first layer via a
        # lazy broadcast instead of materializing nmc HBM copies here.
        self.architecture = lambda x: x
        self.likelihood = None

    def forward(self, x):
        # input * ones(nmc, *input.shape) -> (nmc, *input.shape)
        x_mc = mc_expand(x, self.nmc)
        return self.architecture(x_mc)


if __name__ == "__main__":
    key = jax.random.PRNGKey(0)
    k1, k2, k3 = jax.random.split(key, 3)
    nmc = 3
    net = BaseBayesianNetPallas(nmc=nmc)

    # Case 1: conv-style NCHW input whose size is a multiple of 128 (no tail).
    x = jax.random.normal(k1, (2, 4, 16, 16), dtype=jnp.float32)
    y = jax.block_until_ready(mc_expand(x, nmc, force_pallas=True))
    expected = x[None] * jnp.ones((nmc,) + x.shape, dtype=jnp.float32)
    assert y.shape == (nmc, 2, 4, 16, 16), y.shape
    assert y.dtype == expected.dtype
    assert bool(jnp.allclose(y, expected)), "mismatch vs reference broadcast"

    # Case 2: ragged size (not a multiple of 128) -> padded-tail path.
    x2 = jax.random.normal(k2, (2, 3, 10, 10), dtype=jnp.float32)
    y2 = jax.block_until_ready(mc_expand(x2, nmc, force_pallas=True))
    assert y2.shape == (nmc, 2, 3, 10, 10)
    assert bool(jnp.allclose(y2, jnp.broadcast_to(x2[None], (nmc,) + x2.shape)))

    # Case 3: force a multi-row-tile grid with a partial last block
    # (exercises Pallas boundary masking on the output).
    x3 = jax.random.normal(k3, (4, 4, 13, 13), dtype=jnp.float32)
    y3 = jax.block_until_ready(mc_expand(x3, nmc, force_pallas=True, tile_rows=8))
    assert y3.shape == (nmc, 4, 4, 13, 13)
    assert bool(jnp.allclose(y3, jnp.broadcast_to(x3[None], (nmc,) + x3.shape)))

    # Full module forward (small input takes the XLA broadcast fast path).
    yf = jax.block_until_ready(net.forward(x))
    assert yf.shape == (nmc, 2, 4, 16, 16)
    assert bool(jnp.allclose(yf, expected))

    print("KERNEL_OK")
</pallas_src>

<mosaic_0001>
module attributes {stable_mosaic.version = 11 : i64} {
  func.func @_mc_expand_kernel(%arg0: i32, %arg1: i32, %arg2: memref<16x128xf32, #tpu.memory_space<vmem>>, %arg3: memref<1x16x128xf32, #tpu.memory_space<vmem>>) attributes {dimension_semantics = [#tpu.dimension_semantics<parallel>, #tpu.dimension_semantics<parallel>], iteration_bounds = array<i64: 1, 3>, scalar_prefetch = 0 : i64, scratch_operands = 0 : i64, tpu.core_type = #tpu.core_type<tc>, window_params = [{transform_indices = @transform_0, window_bounds = array<i64: 16, 128>}, {transform_indices = @transform_1, window_bounds = array<i64: 1, 16, 128>}]} {
    %c0 = arith.constant 0 : index
    %c0_0 = arith.constant 0 : index
    %0 = vector.load %arg2[%c0, %c0_0] : memref<16x128xf32, #tpu.memory_space<vmem>>, vector<16x128xf32>
    %c0_1 = arith.constant 0 : index
    %c0_2 = arith.constant 0 : index
    %c0_3 = arith.constant 0 : index
    %1 = vector.load %arg3[%c0_1, %c0_2, %c0_3] : memref<1x16x128xf32, #tpu.memory_space<vmem>>, vector<1x16x128xf32>
    %2 = vector.shape_cast %1 : vector<1x16x128xf32> to vector<16x128xf32>
    %3 = vector.shape_cast %0 : vector<16x128xf32> to vector<1x16x128xf32>
    tpu.vector_store %arg3[%c0_1, %c0_2, %c0_3], %3 {strides = array<i32>} : memref<1x16x128xf32, #tpu.memory_space<vmem>>, vector<1x16x128xf32>,
    return
  }
  func.func @transform_0(%arg0: i32, %arg1: i32) -> (i32, i32) {
    %c0_i32 = arith.constant 0 : i32
    %c0_i32_0 = arith.constant 0 : i32
    return %arg0, %c0_i32 : i32, i32
  }
  func.func @transform_1(%arg0: i32, %arg1: i32) -> (i32, i32, i32) {
    %c0_i32 = arith.constant 0 : i32
    %c0_i32_0 = arith.constant 0 : i32
    return %arg1, %arg0, %c0_i32 : i32, i32, i32
  }
}

</mosaic_0001>

<bundles_post_ra>
// kernel: tpu_custom_call.1
= control target key start
LH: loop header
LB: loop body
LE: loop exit
PB: predicated region body
PF: predicated region fallthrough
CT: control target
= control target key end

     0   :  { %6 = vsyncpa [#allocation3], 0  ;;  %s540_s0 = inlined_call_operand.hbm [shape: f32[16,128], index: 0, kind: input, shape index: {}]   ;;  %s541_s1 = inlined_call_operand.hbm [shape: f32[3,16,128], index: 1, kind: output, shape index: {}]  }
   0x1   :  { %7 = vsyncpa [#allocation4], 0 }
   0x2   :  { %9 = vsyncpa [#allocation4 + $0x1], 0  ;;  %s445_s6 = smov 0   ;;  %s447_s7 = smov 0  }
   0x3   :  { %s449_s8 = smov 0   ;;  %s451_s9 = smov 0  }
   0x4   :  { %s453_s10 = smov 0   ;;  %s455_s11 = smov 0  }
   0x5 LB: > { %s233_s12 = sadd.s32 4294967295, %s428_s11   ;;  %s234_s13 = sadd.s32 4294967294, %s428_s11   ;;  %s428_s11 = sphi %s455_s11, %s15_s11   ;;  %s424_s10 = sphi %s453_s10, %s548_s10   ;;  %s420_s9 = sphi %s451_s9, %s547_s9   ;;  %s416_s8 = sphi %s449_s8, %s546_s8   ;;  %s412_s7 = sphi %s447_s7, %s545_s7   ;;  %s408_s6 = sphi %s445_s6, %s544_s6  }
   0x6   : > { %s24_s14 = sadd.s32 1, %s424_s10  ;;  %s62_s15 = sadd.s32 1, %s416_s8 }
   0x7   : > { %p25_p0 = scmp.ge.s32.totalorder %s24_s14, 3  ;;  %p72_p1 = scmp.ne.s32.totalorder %s416_s8, %s412_s7 }
   0x8   : > { %p73_p2 = scmp.eq.s32.totalorder %s233_s12, 2  ;;  %p78_p3 = scmp.ne.s32.totalorder %s412_s7, %s408_s6 }
   0x9   : > { %s550_s14 = smov (%p25_p0, %s24_s14), 0  ;;  %p79_p5 = scmp.eq.s32.totalorder %s234_s13, 2 }
   0xa   : > { %p485_p4 = por %p73_p2, %p72_p1  ;;  %s57_s17 = ssub.s32 %s424_s10, %s550_s14 }
   0xb   : > { %p235_p6 = scmp.ge.s32.totalorder %s428_s11, 1  ;;  %p60_p7 = scmp.eq.s32.totalorder %s57_s17, 0 }
   0xc   : > { %p492_p8 = por %p79_p5, %p78_p3  ;;  %p86_p9 = scmp.lt.s32.totalorder %s428_s11, 4 }
   0xd   : > { %s498_s19 = scalar_select %p60_p7, %s416_s8, %s62_s15  }
   0xe   : > { %p87_p10 = pnand %p235_p6, %p86_p9  ;;  %p260_p11 = scmp.eq.s32.totalorder %s233_s12, 0 }
   0xf   : > { %s100_s22 = sshll.u32 %s540_s0, 4  ;;  %s430_s23 = smov [#allocation2]   ;;  %s101_s22 = int_to_ptr.hbm [resolvable:$true] %s100_s22 }
  0x10   : > { %p252_p12 = pneg %p87_p10  ;;  %s102_s24 = sshll.u32 %s430_s23, 4  ;;  %s103_s24 = int_to_ptr.vmem [resolvable:$true] %s102_s24 }
  0x11   : > { %s431_s25 = smov 128   ;;  %s432_s26 = smov 8  }
  0x12   : > { %p253_p13 = pnand %p260_p11, %p252_p12  ;;  %118 = sbr.rel (%p87_p10) target bundleno = 41 (0x29), region = 24 }
  0x14   : > { %255 = dma.hbm_to_vmem [thread:$0]  (!%p253_p13), %s101_s22, 256, %s103_s24, [#allocation3], %s431_s25, %s431_s25, %s432_s26  }
  0x17   : > { %399 = dma.done.wait (%p260_p11), [#allocation3], 256  }
  0x18   : > { %401 = vsyncadd (%p260_p11), [#allocation3], 4294967040  ;;  %s131_s27 = sand.u32 1, %s412_s7   ;;  %s245_s28 = sshll.u32 %s420_s9, 4  ;;  %v136_v0 = vld [vmem:[#allocation2] sm:$0xff]  ;;  %v137_v1 = vld [vmem:[#allocation2 + $0x8] sm:$0xff] }
  0x19   : > { %s239_s29 = sshll.u32 %s131_s27, 4  ;;  %s154_s3 = scalar_lea.hbm %s541_s1, %s245_s28 }
  0x1a   : > { %s133_s4 = scalar_lea.vmem [#allocation5], %s239_s29  ;;  %s157_s12 = sshll.u32 %s154_s3, 4  ;;  %s158_s12 = int_to_ptr.hbm [resolvable:$true] %s157_s12 }
  0x1b   : > { %s155_s5 = sshll.u32 %s133_s4, 4  ;;  %138 = vst [vmem:[%s133_s4] sm:$0xff] %v136_v0  ;;  %s141_s13 = scalar_lea.sflag [#allocation4], %s131_s27  ;;  %s156_s5 = int_to_ptr.vmem [resolvable:$true] %s155_s5 }
  0x1c   : > { %139 = vst [vmem:[%s133_s4 + $0x8] sm:$0xff] %v137_v1  ;;  %s360_s15 = sshra.s32 %s158_s12, 4  ;;  %s366_s21 = scalar_lea.hbm %s541_s1, 48  ;;  %s361_s15 = int_to_ptr.hbm [resolvable:$true] %s360_s15 }
  0x1d   : > { %s362_s17 = scalar_lea.hbm %s361_s15, 16  ;;  %p367_p3 = scmp.lt.s32.totalorder %s361_s15, %s541_s1 }
  0x1e   : > { %p363_p0 = scmp.ne.s32.totalorder %s361_s15, %s362_s17  ;;  %p368_p5 = scmp.lt.s32.totalorder %s366_s21, %s362_s17 }
  0x20   : > { %p364_p1 = pnand %p363_p0, %p485_p4  ;;  %p369_p6 = por %p368_p5, %p367_p3 }
  0x22   : > { %p365_p2 = pneg %p364_p1 }
  0x24   : > { %p370_p7 = pnand %p369_p6, %p365_p2 }
  0x26   : > { %373 = shalt.err (!%p370_p7)
}
  0x27   : > { %s433_s24 = smov 128   ;;  %s434_s25 = smov 8  }
  0x28   : > { %250 = dma.vmem_to_hbm [thread:$0]  (%p485_p4), %s156_s5, 256, %s158_s12, %s141_s13, %s433_s24, %s433_s24, %s434_s25  }
  0x29 PF: > { %p262_p9 = scmp.ge.s32.totalorder %s428_s11, 2  ;;  %s172_s26 = sand.u32 1, %s408_s6  }
  0x2a   : > { %s173_s27 = scalar_lea.sflag [#allocation4], %s172_s26 }
  0x2b   : > { %p257_p10 = pnand %p262_p9, %p492_p8 }
  0x2d   : > { %p258_p11 = pneg %p257_p10 }
  0x2f   : > { %403 = dma.done.wait (%p258_p11), %s173_s27, 256  }
  0x30   : > { %405 = vsyncadd (%p258_p11), %s173_s27, 4294967040  ;;  %s15_s11 = sadd.s32 1, %s428_s11   ;;  %s544_s6 = smov %s412_s7 }
  0x31   : > { %p12_p12 = scmp.ge.s32.totalorder %s15_s11, 5   ;;  %s545_s7 = smov %s416_s8 }
  0x32   : > { %s546_s8 = smov %s498_s19  ;;  %s547_s9 = smov %s424_s10 }
  0x33   : > { %s548_s10 = smov %s550_s14  ;;  %14 = sbr.rel (!%p12_p12) target bundleno = 5 (0x5), region = 62 }
  0x38   :  { %179 = vsyncpa [#allocation3], 1 }
  0x39   :  { %181 = vsyncpa [#allocation3 + $0x1], 1 }
  0x3a   :  { %182 = vsyncpa [#allocation4], 1 }
  0x3b   :  { %184 = vsyncpa [#allocation4 + $0x1], 1 }

</bundles_post_ra>
